<compile_context>
chip_gen: v7x
topology: tpu7x:2x2x1
jax: 0.10.0
libtpu: 0.0.40
codegen_flags: <defaults>
</compile_context>

<pallas_src>
import jax
import jax.numpy as jnp
from jax.experimental import pallas as pl
from jax.experimental.pallas import tpu as pltpu


def _gauss_interleave_kernel(x_ref, std2_ref, sx_ref, out_ref):
    # x_ref:    (TB, TD)      activation tile
    # std2_ref: (1, 2*TD)     f32, odd lanes = softplus(rho), even lanes = 0
    # sx_ref:   (TD, 2*TD)    bf16 one-hot scatter matrix, Sx[d, 2d] = 1
    # out_ref:  (TB, 2*TD)    interleaved output tile (lane-dense stores)
    x = x_ref[...]
    sx = sx_ref[...]

    if x.dtype == jnp.bfloat16:
        # bf16 * 1.0 is exact and the f32 accumulation only ever adds zeros:
        # a single DEFAULT-precision MXU pass reproduces x bit-exactly.
        sel = jnp.dot(x, sx, preferred_element_type=jnp.float32)
    else:
        # Exact 3-way bf16 split of f32 (hi + mid + lo == x for finite values).
        # Three single-pass DEFAULT dots against the {0,1} bf16 Sx replace the
        # ~6-pass Precision.HIGHEST decomposition; MXU hides under DMA on v5e.
        xf = x.astype(jnp.float32)
        hi = xf.astype(jnp.bfloat16)
        r1 = jnp.where(jnp.isfinite(xf), xf - hi.astype(jnp.float32), 0.0)
        mid = r1.astype(jnp.bfloat16)
        lo = (r1 - mid.astype(jnp.float32)).astype(jnp.bfloat16)
        sel = (jnp.dot(hi, sx, preferred_element_type=jnp.float32)
               + jnp.dot(mid, sx, preferred_element_type=jnp.float32)
               + jnp.dot(lo, sx, preferred_element_type=jnp.float32))

    out_ref[...] = (sel + std2_ref[...]).astype(out_ref.dtype)


def _round_up(n: int, m: int) -> int:
    return ((n + m - 1) // m) * m


def gauss_layer_forward(x: jax.Array, rho: jax.Array, *,
                        block_b: int | None = None,
                        block_d: int | None = None) -> jax.Array:
    """x: (..., D), rho: (D,). Returns x.shape + (2,) with [...,0]=x, [...,1]=softplus(rho)."""
    orig_shape = x.shape
    D = orig_shape[-1]
    assert rho.shape == (D,), (rho.shape, D)

    x2 = x.reshape(-1, D)            # free row-major flatten of the leading dims
    B = x2.shape[0]

    # ---- D tiling: TD = 128 everywhere (v5e-safe), pad large non-aligned D ----
    if block_d is not None:
        TD = block_d
        Dp = _round_up(D, TD)
    elif D % 128 == 0:
        TD = 128
        Dp = D
    elif D <= 256:
        TD = D                        # small full-dim block (always legal)
        Dp = D
    else:
        TD = 128
        Dp = _round_up(D, 128)        # pad instead of a compute-bound TD=D fallback
    nd = Dp // TD

    # ---- B tiling: big tiles for DMA efficiency, but >= 8 grid steps for v7x ----
    if block_b is not None:
        TB = block_b
    else:
        TB = min(_round_up(B, 8), 2048)
        while TB > 256 and (-(-B // TB)) * nd < 8:
            TB = max(256, _round_up(TB // 2, 8))
    Bp = _round_up(B, TB)
    nb = Bp // TB

    pad_b, pad_d = Bp - B, Dp - D
    if pad_b or pad_d:
        x2 = jnp.pad(x2, ((0, pad_b), (0, pad_d)))

    # softplus(rho) hoisted out of the kernel; odd lanes carry std, even lanes 0.
    std = jax.nn.softplus(rho.astype(jnp.float32))                  # (D,)
    if pad_d:
        std = jnp.pad(std, (0, pad_d))
    std2 = jnp.stack([jnp.zeros_like(std), std], axis=-1).reshape(1, 2 * Dp)

    # One-hot scatter matrix in bf16 (0/1 exact; half the VMEM of f32).
    sx = jax.nn.one_hot(2 * jnp.arange(TD), 2 * TD, dtype=jnp.bfloat16)

    out = pl.pallas_call(
        _gauss_interleave_kernel,
        out_shape=jax.ShapeDtypeStruct((Bp, 2 * Dp), x.dtype),
        grid_spec=pltpu.PrefetchScalarGridSpec(
            num_scalar_prefetch=0,
            grid=(nb, nd),
            in_specs=[
                pl.BlockSpec((TB, TD), lambda i, j: (i, j)),       # x tile
                pl.BlockSpec((1, 2 * TD), lambda i, j: (0, j)),    # std row (follows D)
                pl.BlockSpec((TD, 2 * TD), lambda i, j: (0, 0)),   # Sx (constant index -> DMA'd once)
            ],
            out_specs=pl.BlockSpec((TB, 2 * TD), lambda i, j: (i, j)),
        ),
        compiler_params=pltpu.CompilerParams(
            dimension_semantics=("parallel", "parallel"),
            vmem_limit_bytes=32 * 1024 * 1024,
        ),
    )(x2, std2, sx)

    if pad_b or pad_d:
        out = out.reshape(Bp, Dp, 2)[:B, :D]
        return out.reshape(*orig_shape, 2)
    # Free row-major reshape: interleaved (B, 2D) == stack(..., dim=-1) of (B, D).
    return out.reshape(*orig_shape, 2)


if __name__ == "__main__":
    key = jax.random.PRNGKey(0)

    # Small shapes consistent with GaussLayer: input (..., D), rho (D,).
    B0, B1, D = 4, 16, 384
    x = jax.random.normal(key, (B0, B1, D), dtype=jnp.float32)

    # GaussLayer.__init__: rho = log(exp(std_init) - 1)  =>  softplus(rho) == std_init.
    std_init = jnp.full((D,), 0.5, dtype=jnp.float32)
    rho = jnp.log(jnp.exp(std_init) - 1.0)

    std_ref = jax.nn.softplus(rho)
    ref_std = jnp.broadcast_to(std_ref, x.shape)

    # 1) f32, default tiling.
    out = jax.block_until_ready(gauss_layer_forward(x, rho))
    assert out.shape == (B0, B1, D, 2), out.shape
    assert bool(jnp.all(out[..., 0] == x)), "even-lane copy of x is not bit-exact"
    assert jnp.allclose(out[..., 1], ref_std, atol=1e-6, rtol=1e-6)

    # 2) f32, explicit small blocks -> exercises both grid axes (grid = (4, 3)).
    out2 = jax.block_until_ready(gauss_layer_forward(x, rho, block_b=16, block_d=128))
    assert bool(jnp.all(out2[..., 0] == x))
    assert jnp.allclose(out2[..., 1], ref_std, atol=1e-6, rtol=1e-6)

    # 3) bf16 activations -> single-pass MXU path, still bit-exact on channel 0.
    xb = x.astype(jnp.bfloat16).reshape(B0 * B1, D)
    outb = jax.block_until_ready(gauss_layer_forward(xb, rho))
    assert outb.dtype == jnp.bfloat16 and outb.shape == (B0 * B1, D, 2)
    assert bool(jnp.all(outb[..., 0] == xb))
    assert jnp.allclose(outb[..., 1].astype(jnp.float32),
                        jnp.broadcast_to(std_ref, xb.shape), atol=5e-3, rtol=5e-3)

    # 4) Non-128-multiple feature dim + padded batch (full-dim D block path).
    Dx = 100
    x3 = jax.random.normal(jax.random.PRNGKey(1), (6, Dx), dtype=jnp.float32)
    rho3 = jnp.log(jnp.exp(jnp.full((Dx,), 0.25, dtype=jnp.float32)) - 1.0)
    out3 = jax.block_until_ready(gauss_layer_forward(x3, rho3))
    assert out3.shape == (6, Dx, 2)
    assert bool(jnp.all(out3[..., 0] == x3))
    assert jnp.allclose(out3[..., 1],
                        jnp.broadcast_to(jax.nn.softplus(rho3), x3.shape),
                        atol=1e-6, rtol=1e-6)

    print("KERNEL_OK")
</pallas_src>

<mosaic_0001>
module attributes {stable_mosaic.version = 11 : i64} {
  func.func @_gauss_interleave_kernel(%arg0: i32, %arg1: i32, %arg2: memref<64x128xf32, #tpu.memory_space<vmem>>, %arg3: memref<1x256xf32, #tpu.memory_space<vmem>>, %arg4: memref<128x256xbf16, #tpu.memory_space<vmem>>, %arg5: memref<64x256xf32, #tpu.memory_space<vmem>>) attributes {dimension_semantics = [#tpu.dimension_semantics<parallel>, #tpu.dimension_semantics<parallel>], iteration_bounds = array<i64: 1, 3>, scalar_prefetch = 0 : i64, scratch_operands = 0 : i64, tpu.core_type = #tpu.core_type<tc>, window_params = [{transform_indices = @transform_0, window_bounds = array<i64: 64, 128>}, {transform_indices = @transform_1, window_bounds = array<i64: 1, 256>}, {pipeline_mode = #tpu.pipeline_mode<synchronous>, transform_indices = @transform_2, window_bounds = array<i64: 128, 256>}, {transform_indices = @transform_3, window_bounds = array<i64: 64, 256>}]} {
    %c0 = arith.constant 0 : index
    %c0_0 = arith.constant 0 : index
    %0 = vector.load %arg2[%c0, %c0_0] : memref<64x128xf32, #tpu.memory_space<vmem>>, vector<64x128xf32>
    %c0_1 = arith.constant 0 : index
    %c0_2 = arith.constant 0 : index
    %1 = vector.load %arg4[%c0_1, %c0_2] : memref<128x256xbf16, #tpu.memory_space<vmem>>, vector<128x256xbf16>
    %2 = arith.truncf %0 : vector<64x128xf32> to vector<64x128xbf16>
    %3 = tpu.weird %0 : vector<64x128xf32> -> vector<64x128xi1>
    %cst = arith.constant dense<true> : vector<64x128xi1>
    %4 = arith.xori %3, %cst : vector<64x128xi1>
    %5 = arith.extf %2 : vector<64x128xbf16> to vector<64x128xf32>
    %6 = arith.subf %0, %5 : vector<64x128xf32>
    %cst_3 = arith.constant 0.000000e+00 : f32
    %7 = vector.broadcast %cst_3 : f32 to vector<64x128xf32>
    %8 = arith.select %4, %6, %7 : vector<64x128xi1>, vector<64x128xf32>
    %9 = arith.truncf %8 : vector<64x128xf32> to vector<64x128xbf16>
    %10 = arith.extf %9 : vector<64x128xbf16> to vector<64x128xf32>
    %11 = arith.subf %8, %10 : vector<64x128xf32>
    %12 = arith.truncf %11 : vector<64x128xf32> to vector<64x128xbf16>
    %cst_4 = arith.constant dense<0.000000e+00> : vector<64x256xf32>
    %13 = tpu.matmul %2, %1, %cst_4 {dimension_numbers = #tpu.dot_dimension_numbers<[1], [0], [0], [1], [0, 0, 1, 1], [], []>} : vector<64x128xbf16>, vector<128x256xbf16>, vector<64x256xf32> -> vector<64x256xf32>
    %cst_5 = arith.constant dense<0.000000e+00> : vector<64x256xf32>
    %14 = tpu.matmul %9, %1, %cst_5 {dimension_numbers = #tpu.dot_dimension_numbers<[1], [0], [0], [1], [0, 0, 1, 1], [], []>} : vector<64x128xbf16>, vector<128x256xbf16>, vector<64x256xf32> -> vector<64x256xf32>
    %15 = arith.addf %13, %14 : vector<64x256xf32>
    %cst_6 = arith.constant dense<0.000000e+00> : vector<64x256xf32>
    %16 = tpu.matmul %12, %1, %cst_6 {dimension_numbers = #tpu.dot_dimension_numbers<[1], [0], [0], [1], [0, 0, 1, 1], [], []>} : vector<64x128xbf16>, vector<128x256xbf16>, vector<64x256xf32> -> vector<64x256xf32>
    %17 = arith.addf %15, %16 : vector<64x256xf32>
    %c0_7 = arith.constant 0 : index
    %c0_8 = arith.constant 0 : index
    %18 = vector.load %arg3[%c0_7, %c0_8] : memref<1x256xf32, #tpu.memory_space<vmem>>, vector<1x256xf32>
    %19 = vector.broadcast %18 : vector<1x256xf32> to vector<64x256xf32>
    %20 = arith.addf %17, %19 : vector<64x256xf32>
    %c0_9 = arith.constant 0 : index
    %c0_10 = arith.constant 0 : index
    %21 = vector.load %arg5[%c0_9, %c0_10] : memref<64x256xf32, #tpu.memory_space<vmem>>, vector<64x256xf32>
    tpu.vector_store %arg5[%c0_9, %c0_10], %20 {strides = array<i32>} : memref<64x256xf32, #tpu.memory_space<vmem>>, vector<64x256xf32>,
    return
  }
  func.func @transform_0(%arg0: i32, %arg1: i32) -> (i32, i32) {
    %c0_i32 = arith.constant 0 : i32
    return %arg0, %arg1 : i32, i32
  }
  func.func @transform_1(%arg0: i32, %arg1: i32) -> (i32, i32) {
    %c0_i32 = arith.constant 0 : i32
    %c0_i32_0 = arith.constant 0 : i32
    return %c0_i32, %arg1 : i32, i32
  }
  func.func @transform_2(%arg0: i32, %arg1: i32) -> (i32, i32) {
    %c0_i32 = arith.constant 0 : i32
    %c0_i32_0 = arith.constant 0 : i32
    %c0_i32_1 = arith.constant 0 : i32
    return %c0_i32, %c0_i32_0 : i32, i32
  }
  func.func @transform_3(%arg0: i32, %arg1: i32) -> (i32, i32) {
    %c0_i32 = arith.constant 0 : i32
    return %arg0, %arg1 : i32, i32
  }
}

</mosaic_0001>

<bundles_post_ra>
// kernel: tpu_custom_call.1
= control target key start
LH: loop header
LB: loop body
LE: loop exit
PB: predicated region body
PF: predicated region fallthrough
CT: control target
= control target key end

     0   :  { %s1780_s0 = inlined_call_operand.hbm [shape: f32[64,384], index: 0, kind: input, shape index: {}]   ;;  %s1781_s1 = inlined_call_operand.hbm [shape: f32[1,768], index: 1, kind: input, shape index: {}]   ;;  %s1782_s2 = inlined_call_operand.hbm [shape: bf16[128,256], index: 2, kind: input, shape index: {}]   ;;  %s1783_s3 = inlined_call_operand.hbm [shape: f32[64,768], index: 3, kind: output, shape index: {}]  }
   0x1   :  { %1791 = sst [smem:[#allocation15_spill]] %s1780_s0 }
   0x2   :  { %1792 = sst [smem:[#allocation16_spill]] %s1782_s2 }
   0x3   :  { %8 = vsyncpa [#allocation3], 0 }
   0x4   :  { %10 = vsyncpa [#allocation3 + $0x1], 0 }
   0x5   :  { %11 = vsyncpa [#allocation6], 0 }
   0x6   :  { %13 = vsyncpa [#allocation6 + $0x1], 0 }
   0x7   :  { %14 = vsyncpa [#allocation4], 0 }
   0x8   :  { %16 = vsyncpa [#allocation4 + $0x1], 0  ;;  %s1270_s12 = smov 0   ;;  %s1272_s13 = smov 0  }
   0x9   :  { %s1274_s14 = smov 0   ;;  %s1276_s15 = smov 0  }
   0xa   :  { %s1278_s16 = smov 0   ;;  %s1280_s17 = smov 0  }
   0xb LB: > { %s1301_s18 = sadd.s32 4294967295, %s1236_s17   ;;  %s851_s19 = sadd.s32 4294967294, %s1236_s17   ;;  %s1236_s17 = sphi %s1280_s17, %s22_s17   ;;  %s1232_s16 = sphi %s1278_s16, %s1836_s16   ;;  %s1228_s15 = sphi %s1276_s15, %s1835_s15   ;;  %s1224_s14 = sphi %s1274_s14, %s1834_s14   ;;  %s1220_s13 = sphi %s1272_s13, %s1833_s13   ;;  %s1216_s12 = sphi %s1270_s12, %s1832_s12  }
   0xc   : > { %s43_s20 = sadd.s32 1, %s1224_s14  ;;  %p50_p0 = scmp.ne.s32.totalorder %s1224_s14, %s1220_s13 }
   0xd   : > { %p51_p1 = scmp.eq.s32.totalorder %s1236_s17, 0  ;;  %p56_p2 = scmp.ne.s32.totalorder %s1220_s13, %s1216_s12 }
   0xe   : > { %p1784_p3 = scmp.eq.s32.totalorder %s1301_s18, 0  ;;  %p129_p4 = scmp.eq.s32.totalorder %s1301_s18, 2 }
   0xf   : > { %p1312_p5 = por %p51_p1, %p50_p0  ;;  %p135_p6 = scmp.eq.s32.totalorder %s851_s19, 2 }
  0x10   : > { %p1318_p7 = por %p1784_p3, %p56_p2  ;;  %p1322_p8 = por %p129_p4, %p50_p0 }
  0x11   : > { %p1326_p9 = por %p135_p6, %p56_p2  ;;  %p852_p10 = scmp.ge.s32.totalorder %s1236_s17, 1 }
  0x12   : > { %s1794_s22 = scalar_select %p1318_p7, 1, 0 }
  0x13   : > { %s1795_s23 = scalar_select %p1322_p8, 1, 0 }
  0x14   : > { %s1796_s24 = scalar_select %p1326_p9, 1, 0 }
  0x15   : > { %p142_p11 = scmp.lt.s32.totalorder %s1236_s17, 4  ;;  %s1238_s26 = smov [#allocation7]  }
  0x16   : > { %s154_s27 = sshll.u32 %s1238_s26, 4  ;;  %p974_p0 = scmp.lt.s32.totalorder %s1236_s17, 3  ;;  %s1336_s27 = int_to_ptr.vmem [resolvable:$true] %s154_s27 }
  0x17   : > { %p1332_p12 = pnand %p852_p10, %p142_p11  ;;  %s31_s30 = sadd.s32 1, %s1232_s16 }
  0x18   : > { %p1349_p2 = pnand %p974_p0, %p1312_p5  ;;  %p1354_p4 = scmp.ge.s32.totalorder %s31_s30, 3 }
  0x19   : > { %s1797_s25 = scalar_select %p1332_p12, 1, 0 }
  0x1a   : > { %p958_p13 = pneg %p1332_p12  ;;  %s1801_s2 = sld [smem:[#allocation16_spill]] }
  0x1b   : > { %s1799_s29 = scalar_select %p1349_p2, 1, 0 }
  0x1c   : > { %p1343_p1 = pnand %p958_p13, %p1784_p3 }
  0x1d   : > { %s1800_s4 = scalar_select %p1354_p4, 1, 0 }
  0x1e   : > { %p1060_p10 = pneg %p1343_p1 }
  0x20   : > { %s1058_s7 = scalar_lea.hbm %s1801_s2, 2048 }
  0x21   : > { %p1059_p6 = scmp.ne.s32.totalorder %s1801_s2, %s1058_s7  ;;  %p1065_p13 = scmp.lt.u32.totalorder %s1058_s7, %s1801_s2 }
  0x23   : > { %p1061_p11 = pnand %p1060_p10, %p1059_p6 }
  0x25   : > { %p1062_p5 = pneg %p1061_p11 }
  0x27   : > { %p1067_p0 = pnand %p1065_p13, %p1062_p5 }
  0x29   : > { %1070 = shalt.err (!%p1067_p0)
}
  0x2a   : > { %s1071_s19 = scalar_lea.vmem %s1336_s27, 2048  ;;  %p1079_p7 = scmp.lt.s32.totalorder %s1336_s27, %s1336_s27 }
  0x2b   : > { %p1072_p3 = scmp.ne.s32.totalorder %s1336_s27, %s1071_s19  ;;  %p1080_p12 = scmp.lt.s32.totalorder %s1071_s19, %s1071_s19 }
  0x2d   : > { %p1074_p9 = pnand %p1072_p3, %p1060_p10  ;;  %p1081_p2 = por %p1080_p12, %p1079_p7 }
  0x2f   : > { %p1075_p8 = pneg %p1074_p9 }
  0x31   : > { %p1082_p4 = pnand %p1081_p2, %p1075_p8 }
  0x33   : > { %1085 = shalt.err (!%p1082_p4)
}
  0x34   : > { %s1789_s21 = smov 128   ;;  %s1240_s26 = smov 8  }
  0x35   : > { %961 = dma.hbm_to_vmem [thread:$0]  (!%p1343_p1), %s1801_s2, 2048, %s1336_s27, [#allocation6], %s1789_s21, %s1789_s21, %s1240_s26  }
  0x36   : > { %s1383_s7 = sand.u32 1, %s1224_s14   ;;  %p1802_p3 = scmp.ne.s32.totalorder %s1800_s4, 0 }
  0x37   : > { %s855_s8 = sshll.u32 %s1383_s7, 6  ;;  %s856_s28 = sshll.u32 %s1232_s16, 7 }
  0x38   : > { %s1838_s30 = smov (%p1802_p3, %s31_s30), 0  ;;  %s1804_s0 = sld [smem:[#allocation15_spill]] }
  0x39   : > { %1803 = sst [smem:[#allocation13_spill]] %s1838_s30  ;;  %s39_s9 = ssub.s32 %s1232_s16, %s1838_s30 }
  0x3a   : > { %p41_p7 = scmp.eq.s32.totalorder %s39_s9, 0  ;;  %s172_s27 = scalar_lea.vmem [#allocation2], %s855_s8 }
  0x3b   : > { %s181_s4 = sshll.u32 %s172_s27, 4  ;;  %s169_s6 = scalar_lea.sflag [#allocation3], %s1383_s7  ;;  %s1403_s4 = int_to_ptr.vmem [resolvable:$true] %s181_s4 }
  0x3c   : > { %s1401_s5 = scalar_select %p41_p7, %s1224_s14, %s43_s20  }
  0x3d   : > { %p1806_p9 = scmp.ne.s32.totalorder %s1799_s29, 0 }
  0x3e   : > { %s1396_s19 = scalar_lea.hbm %s1804_s0, %s856_s28  ;;  %1805 = sst [smem:[#allocation14_spill]] %s1401_s5 }
  0x3f   : > { %s1086_s21 = scalar_lea.hbm %s1396_s19, 1024  ;;  %p1088_p12 = pneg %p1806_p9 }
  0x40   : > { %p1087_p8 = scmp.ne.s32.totalorder %s1396_s19, %s1086_s21  ;;  %s1091_s10 = scalar_lea.hbm %s1804_s0, 3072 }
  0x41   : > { %p1092_p4 = scmp.lt.u32.totalorder %s1396_s19, %s1804_s0  ;;  %p1093_p6 = scmp.lt.u32.totalorder %s1091_s10, %s1086_s21 }
  0x42   : > { %p1089_p1 = pnand %p1088_p12, %p1087_p8  ;;  %p1095_p11 = scmp.lt.u32.totalorder %s1086_s21, %s1396_s19 }
  0x43   : > { %p1094_p10 = por %p1093_p6, %p1092_p4 }
  0x44   : > { %p1090_p2 = pneg %p1089_p1 }
  0x45   : > { %p1096_p5 = por %p1095_p11, %p1094_p10 }
  0x47   : > { %p1097_p13 = pnand %p1096_p5, %p1090_p2 }
  0x49   : > { %1100 = shalt.err (!%p1097_p13)
}
  0x4a   : > { %s1101_s20 = scalar_lea.vmem %s1403_s4, 1024  ;;  %s1241_s27 = smov [#allocation2]  }
  0x4b   : > { %p1102_p0 = scmp.ne.s32.totalorder %s1403_s4, %s1101_s20  ;;  %s1106_s9 = sshll.u32 %s1241_s27, 4  ;;  %s1107_s9 = int_to_ptr.vmem [resolvable:$false] %s1106_s9 }
  0x4c   : > { %s1108_s28 = scalar_lea.vmem %s1107_s9, 2048  ;;  %p1109_p8 = scmp.lt.s32.totalorder %s1403_s4, %s1107_s9 }
  0x4d   : > { %p1104_p3 = pnand %p1102_p0, %p1088_p12  ;;  %p1110_p1 = scmp.lt.s32.totalorder %s1108_s28, %s1101_s20 }
  0x4f   : > { %p1105_p7 = pneg %p1104_p3  ;;  %p1111_p4 = por %p1110_p1, %p1109_p8 }
  0x51   : > { %p1112_p6 = pnand %p1111_p4, %p1105_p7 }
  0x53   : > { %1115 = shalt.err (!%p1112_p6)
}
  0x54   : > { %s1242_s21 = smov 384   ;;  %s1807_s10 = smov 128  }
  0x55   : > { %965 = dma.hbm_to_vmem [thread:$0]  (!%p1806_p9), %s1396_s19, 1024, %s1403_s4, %s169_s6, %s1242_s21, %s1807_s10, %s1240_s26  }
  0x56   : > { %s191_s8 = sand.u32 1, %s1236_s17   ;;  %s857_s11 = sshll.u32 %s1383_s7, 1 }
  0x57   : > { %s898_s20 = sshll.u32 %s1232_s16, 5  ;;  %s195_s27 = scalar_lea.vmem [#allocation5], %s857_s11 }
  0x58   : > { %s203_s9 = sshll.u32 %s195_s27, 4  ;;  %s1441_s2 = scalar_lea.hbm %s1781_s1, %s898_s20  ;;  %s204_s9 = int_to_ptr.vmem [resolvable:$true] %s203_s9 }
  0x59   : > { %s192_s30 = scalar_lea.sflag [#allocation6], %s191_s8  ;;  %s1116_s5 = scalar_lea.hbm %s1441_s2, 32 }
  0x5a   : > { %p1117_p2 = scmp.ne.s32.totalorder %s1441_s2, %s1116_s5  ;;  %s1121_s19 = scalar_lea.hbm %s1781_s1, 96 }
  0x5b   : > { %p1122_p5 = scmp.lt.u32.totalorder %s1441_s2, %s1781_s1  ;;  %p1123_p13 = scmp.lt.u32.totalorder %s1121_s19, %s1116_s5 }
  0x5c   : > { %p1119_p10 = pnand %p1117_p2, %p1088_p12  ;;  %p1125_p3 = scmp.lt.u32.totalorder %s1116_s5, %s1441_s2 }
  0x5d   : > { %p1124_p0 = por %p1123_p13, %p1122_p5 }
  0x5e   : > { %p1120_p11 = pneg %p1119_p10 }
  0x5f   : > { %p1126_p7 = por %p1125_p3, %p1124_p0 }
  0x61   : > { %p1127_p8 = pnand %p1126_p7, %p1120_p11 }
  0x63   : > { %1130 = shalt.err (!%p1127_p8)
}
  0x64   : > { %s1131_s6 = scalar_lea.vmem %s204_s9, 32  ;;  %s1243_s21 = smov [#allocation5]  }
  0x65   : > { %p1132_p1 = scmp.ne.s32.totalorder %s204_s9, %s1131_s6  ;;  %s1136_s10 = sshll.u32 %s1243_s21, 4  ;;  %s1137_s10 = int_to_ptr.vmem [resolvable:$false] %s1136_s10 }
  0x66   : > { %s1138_s8 = scalar_lea.vmem %s1137_s10, 64  ;;  %p1139_p2 = scmp.lt.s32.totalorder %s204_s9, %s1137_s10 }
  0x67   : > { %p1134_p4 = pnand %p1132_p1, %p1088_p12  ;;  %p1140_p10 = scmp.lt.s32.totalorder %s1138_s8, %s1131_s6 }
  0x69   : > { %p1135_p6 = pneg %p1134_p4  ;;  %p1141_p5 = por %p1140_p10, %p1139_p2 }
  0x6b   : > { %p1142_p13 = pnand %p1141_p5, %p1135_p6 }
  0x6d   : > { %1145 = shalt.err (!%p1142_p13)
}
  0x6e   : > { %968 = dma.hbm_to_vmem [thread:$0]  (!%p1806_p9), %s1441_s2, 32, %s204_s9, %s192_s30  }
  0x6f   : > { %p1808_p11 = scmp.ne.s32.totalorder %s1797_s25, 0 }
  0x70   : > { %s1465_s5 = sand.u32 (!%p1808_p11), 1, %s1220_s13   ;;  %p1809_p12 = scmp.ne.s32.totalorder (!%p1808_p11), %s1794_s22, 0 }
  0x71   : > { %212 = sbr.rel (%p1808_p11) target bundleno = 436 (0x1b4), region = 32  ;;  %s861_s11 = sshll.u32 (!%p1808_p11), %s1465_s5, 6 }
  0x72   : > { %s215_s20 = scalar_lea.sflag (!%p1808_p11), [#allocation3], %s1465_s5  ;;  %s1469_s27 = scalar_lea.vmem (!%p1808_p11), [#allocation2], %s861_s11 }
  0x78   : > { %1199 = dma.done.wait (%p1809_p12), %s215_s20, 1024  }
  0x79   : > { %1201 = vsyncadd (%p1809_p12), %s215_s20, 4294966272  ;;  %s223_s2 = sand.u32 1, %s1301_s18   ;;  %s862_s25 = sshll.u32 %s1465_s5, 1 }
  0x7a   : > { %s224_s29 = scalar_lea.sflag [#allocation6], %s223_s2  ;;  %s1477_s30 = scalar_lea.vmem [#allocation5], %s862_s25 }
  0x7b   : > { %1203 = dma.done.wait (%p1809_p12), %s224_s29, 32  }
  0x7c   : > { %1205 = vsyncadd (%p1809_p12), %s224_s29, 4294967264  ;;  %p1810_p9 = scmp.eq.s32.totalorder %s1301_s18, 0 }
  0x7e   : > { %1207 = dma.done.wait (%p1810_p9), [#allocation6], 2048   ;;  %p1811_p0 = pmov %p1810_p9 }
  0x7f   : > { %v1244_v0 = vmov 0   ;;  %v1489_v1 = vld [vmem:[#allocation7 + $0x4] ss:$8 sps:$4 sm:$0xff]   ;;  %v1491_v2 = vld [vmem:[#allocation7] ss:$8 sps:$4 sm:$0xff]   ;;  %v267_v21 = vld [vmem:[%s1469_s27 + $0x18] sm:$0xff] }
  0x80   : > { %1209 = vsyncadd (%p1811_p0), [#allocation6], 4294965248  ;;  %468 = vmatprep.mubr.bf16.mxu1 %v1244_v0  ;;  %541 = vmatprep.mubr.bf16.mxu0 %v1244_v0  ;;  %v1495_v3 = vld [vmem:[#allocation7 + $0x14] ss:$8 sps:$4 sm:$0xff]   ;;  %v1499_v4 = vld [vmem:[#allocation7 + $0x10] ss:$8 sps:$4 sm:$0xff]   ;;  %vm295_vm7 = vweird.f32 %v267_v21 }
  0x81   : > { %436 = vmatprep.subr.bf16.mxu1 %v1489_v1  ;;  %509 = vmatprep.subr.bf16.mxu0 %v1489_v1  ;;  %v1503_v5 = vld [vmem:[#allocation7 + $0x24] ss:$8 sps:$4 sm:$0xff]   ;;  %v1507_v6 = vld [vmem:[#allocation7 + $0x20] ss:$8 sps:$4 sm:$0xff]   ;;  %v1511_v7 = vld [vmem:[#allocation7 + $0x34] ss:$8 sps:$4 sm:$0xff]  }
  0x82   : > { %437 = vmatpush1.bf16.msra.mxu1 %v1491_v2  ;;  %510 = vmatpush1.bf16.msra.mxu0 %v1491_v2  ;;  %v1515_v8 = vld [vmem:[#allocation7 + $0x30] ss:$8 sps:$4 sm:$0xff]   ;;  %v1519_v9 = vld [vmem:[#allocation7 + $0x44] ss:$8 sps:$4 sm:$0xff]   ;;  %v1523_v10 = vld [vmem:[#allocation7 + $0x40] ss:$8 sps:$4 sm:$0xff]  }
  0x83   : > { %438 = vmatprep.subr.bf16.mxu1 %v1495_v3  ;;  %511 = vmatprep.subr.bf16.mxu0 %v1495_v3  ;;  %v264_v11 = vld [vmem:[%s1469_s27] sm:$0xff]  ;;  %v265_v12 = vld [vmem:[%s1469_s27 + $0x8] sm:$0xff]  ;;  %v1533_v15 = vld [vmem:[#allocation7 + $0x50] ss:$8 sps:$4 sm:$0xff]   ;;  %vm1245_vm2 = vmmov 1   ;;  %s864_s18 = sshll.u32 %s1465_s5, 7 }
  0x84   : > { %v1529_v13 = vld [vmem:[#allocation7 + $0x54] ss:$8 sps:$4 sm:$0xff]   ;;  %v288_v14 = vpack.c.bf16 %v265_v12, %v264_v11  ;;  %v1537_v16 = vld [vmem:[#allocation7 + $0x64] ss:$8 sps:$4 sm:$0xff]   ;;  %v1541_v19 = vld [vmem:[#allocation7 + $0x60] ss:$8 sps:$4 sm:$0xff]   ;;  %vm292_vm0 = vweird.f32 %v264_v11  ;;  %vm293_vm1 = vweird.f32 %v265_v12 }
  0x85   : > { %v266_v20 = vld [vmem:[%s1469_s27 + $0x10] sm:$0xff]  ;;  %v1547_v22 = vld [vmem:[#allocation7 + $0x74] ss:$8 sps:$4 sm:$0xff]   ;;  %vm1554_vm3 = vmxor %vm292_vm0, %vm1245_vm2  ;;  %s1697_s22 = scalar_lea.vmem [#allocation8], %s864_s18  ;;  %s899_s9 = sshll.u32 %s1228_s15, 8 }
  0x86   : > { %439 = vmatpush1.bf16.msra.mxu1 %v1499_v4  ;;  %512 = vmatpush1.bf16.msra.mxu0 %v1499_v4  ;;  %v308_v17 = vunpack.c.l.bf16 %v288_v14  ;;  %v309_v18 = vunpack.c.h.bf16 %v288_v14  ;;  %v289_v25 = vpack.c.bf16 %v267_v21, %v266_v20  ;;  %v1551_v26 = vld [vmem:[#allocation7 + $0x70] ss:$8 sps:$4 sm:$0xff]   ;;  %vm1561_vm4 = vmxor %vm293_vm1, %vm1245_vm2  ;;  %v268_v32 = vld [vmem:[%s1469_s27 + $0x20] sm:$0xff]  ;;  %vm294_vm6 = vweird.f32 %v266_v20  ;;  %s732_s28 = sshll.u32 %s1697_s22, 4  ;;  %s1720_s7 = scalar_lea.hbm %s1783_s3, %s899_s9  ;;  %s1724_s28 = int_to_ptr.vmem [resolvable:$true] %s732_s28 }
  0x87   : > { %440 = vmatprep.subr.bf16.mxu1 %v1503_v5  ;;  %513 = vmatprep.subr.bf16.mxu0 %v1503_v5  ;;  %vm881_vm5 = vmpackc.low %vm1561_vm4, %vm1554_vm3  ;;  %v269_v33 = vld [vmem:[%s1469_s27 + $0x28] sm:$0xff]  ;;  %v270_v42 = vld [vmem:[%s1469_s27 + $0x30] sm:$0xff]  ;;  %vm296_vm11 = vweird.f32 %v268_v32  ;;  %s716_s19 = scalar_lea.sflag [#allocation4], %s1465_s5  ;;  %s1146_s4 = scalar_lea.vmem %s1724_s28, 2048 }
  0x88   : > { %v316_v23 = vsub.f32 %v264_v11, %v308_v17  ;;  %v317_v24 = vsub.f32 %v265_v12, %v309_v18  ;;  %v310_v30 = vunpack.c.l.bf16 %v289_v25  ;;  %v311_v31 = vunpack.c.h.bf16 %v289_v25  ;;  %vm1582_vm8 = vmxor %vm294_vm6, %vm1245_vm2  ;;  %v271_v43 = vld [vmem:[%s1469_s27 + $0x38] sm:$0xff]  ;;  %v671_v60 = vld [vmem:[%s1477_s30] sm:$0x3]  ;;  %p1147_p3 = scmp.ne.s32.totalorder %s1724_s28, %s1146_s4  ;;  %p1828_p7 = scmp.ne.s32.totalorder %s1795_s23, 0 }
  0x89   : > { %v290_v36 = vpack.c.bf16 %v269_v33, %v268_v32  ;;  %vm1589_vm9 = vmxor %vm295_vm7, %vm1245_vm2  ;;  %vm297_vm12 = vweird.f32 %v269_v33  ;;  %v291_v44 = vpack.c.bf16 %v271_v43, %v270_v42  ;;  %vm298_vm0 = vweird.f32 %v270_v42  ;;  %s1246_s0 = smov [#allocation8]  }
  0x8a   : > { %441 = vmatpush1.bf16.msra.mxu1 %v1507_v6  ;;  %514 = vmatpush1.bf16.msra.mxu0 %v1507_v6  ;;  %v882_v29 = vpack.c.bf16 %v317_v24, %v316_v23  ;;  %v1575_v34 = vsub.f32 %v266_v20, %v310_v30  ;;  %v1577_v35 = vsub.f32 %v267_v21, %v311_v31  ;;  %vm884_vm10 = vmpackc.low %vm1589_vm9, %vm1582_vm8  ;;  %v324_v50 = vsel %vm1554_vm3, %v316_v23, 0.0  ;;  %p1148_p8 = pnand %p1147_p3, %p1828_p7  ;;  %s1150_s6 = sshll.u32 %s1246_s0, 4  ;;  %s1151_s6 = int_to_ptr.vmem [resolvable:$false] %s1150_s6 }
  0x8b   : > { %442 = vmatprep.subr.bf16.mxu1 %v1511_v7  ;;  %515 = vmatprep.subr.bf16.mxu0 %v1511_v7  ;;  %v312_v40 = vunpack.c.l.bf16 %v290_v36  ;;  %v313_v41 = vunpack.c.h.bf16 %v290_v36  ;;  %vm1610_vm13 = vmxor %vm296_vm11, %vm1245_vm2  ;;  %v314_v49 = vunpack.c.l.bf16 %v291_v44  ;;  %v325_v51 = vsel %vm1561_vm4, %v317_v24, 0.0  ;;  %s1152_s21 = scalar_lea.vmem %s1151_s6, 4096  ;;  %p1153_p4 = scmp.lt.s32.totalorder %s1724_s28, %s1151_s6 }
  0x8c   : > { %v885_v39 = vpack.c.bf16 %v1577_v35, %v1575_v34  ;;  %vm1617_vm14 = vmxor %vm297_vm12, %vm1245_vm2  ;;  %v315_v53 = vunpack.c.h.bf16 %v291_v44  ;;  %v332_v56 = vpack.c.bf16 %v325_v51, %v324_v50  ;;  %vm299_vm1 = vweird.f32 %v271_v43  ;;  %p1149_p1 = pneg %p1148_p8  ;;  %p1154_p6 = scmp.lt.s32.totalorder %s1152_s21, %s1146_s4 }
  0x8d   : > { %v320_v45 = vsub.f32 %v268_v32, %v312_v40  ;;  %v321_v46 = vsub.f32 %v269_v33, %v313_v41  ;;  %vm887_vm15 = vmpackc.low %vm1617_vm14, %vm1610_vm13  ;;  %v322_v58 = vsub.f32 %v270_v42, %v314_v49 }
  0x8e   : > { %443 = vmatpush1.bf16.msra.mxu1 %v1515_v8  ;;  %516 = vmatpush1.bf16.msra.mxu0 %v1515_v8  ;;  %v323_v59 = vsub.f32 %v271_v43, %v315_v53  ;;  %vm1642_vm3 = vmxor %vm298_vm0, %vm1245_vm2  ;;  %v336_v62 = vunpack.c.l.bf16 %v332_v56  ;;  %v337_v63 = vunpack.c.h.bf16 %v332_v56  ;;  %p1155_p2 = por %p1154_p6, %p1153_p4 }
  0x8f   : > { %444 = vmatprep.subr.bf16.mxu1 %v1519_v9  ;;  %517 = vmatprep.subr.bf16.mxu0 %v1519_v9  ;;  %v888_v52 = vpack.c.bf16 %v321_v46, %v320_v45  ;;  %v328_v54 = vsel %vm1610_vm13, %v320_v45, 0.0  ;;  %v329_v55 = vsel %vm1617_vm14, %v321_v46, 0.0  ;;  %vm1649_vm4 = vmxor %vm299_vm1, %vm1245_vm2 }
  0x90   : > { %v334_v57 = vpack.c.bf16 %v329_v55, %v328_v54  ;;  %vm890_vm2 = vmpackc.low %vm1649_vm4, %vm1642_vm3  ;;  %p1156_p10 = pnand %p1155_p2, %p1149_p1 }
  0x92   : > { %445 = vmatpush1.bf16.msra.mxu1 %v1523_v10  ;;  %518 = vmatpush1.bf16.msra.mxu0 %v1523_v10 }
  0x93   : > { %446 = vmatprep.subr.bf16.mxu1 %v1529_v13  ;;  %519 = vmatprep.subr.bf16.mxu0 %v1529_v13 }
  0x96   : > { %447 = vmatpush1.bf16.msra.mxu1 %v1533_v15  ;;  %520 = vmatpush1.bf16.msra.mxu0 %v1533_v15 }
  0x97   : > { %448 = vmatprep.subr.bf16.mxu1 %v1537_v16  ;;  %521 = vmatprep.subr.bf16.mxu0 %v1537_v16 }
  0x9a   : > { %449 = vmatpush1.bf16.msra.mxu1 %v1541_v19  ;;  %522 = vmatpush1.bf16.msra.mxu0 %v1541_v19 }
  0x9b   : > { %450 = vmatprep.subr.bf16.mxu1 %v1547_v22  ;;  %523 = vmatprep.subr.bf16.mxu0 %v1547_v22 }
  0x9e   : > { %451 = vmatpush1.bf16.msra.mxu1 %v1551_v26  ;;  %524 = vmatpush1.bf16.msra.mxu0 %v1551_v26 }
  0x9f   : > { %582 = vmatprep.subr.bf16.mxu0 %v1489_v1  ;;  %900 = vmatprep.subr.bf16.mxu1 %v1489_v1  ;;  %v326_v1 = vsel %vm1582_vm8, %v1575_v34, 0.0 }
  0xa1   : > { %883 = vmatmul.mubr.msk.bf16.vlgmr.msra.gmra.mrb[0].mxu1 %vm881_vm5, %v882_v29  ;;  %542 = vmatmul.mubr.bf16.vlgmr.msra.gmra.mrb[0].mxu0 %v288_v14 }
  0xa2   : > { %583 = vmatpush1.bf16.msra.mxu0 %v1491_v2  ;;  %908 = vmatpush1.bf16.msra.mxu1 %v1491_v2  ;;  %v327_v2 = vsel %vm1589_vm9, %v1577_v35, 0.0 }
  0xa3   : > { %584 = vmatprep.subr.bf16.mxu0 %v1495_v3  ;;  %901 = vmatprep.subr.bf16.mxu1 %v1495_v3  ;;  %v340_v3 = vunpack.c.l.bf16 %v334_v57 }
  0xa4   : > { %478 = vmatprep.mubr.bf16.mxu1 %v1244_v0  ;;  %551 = vmatprep.mubr.bf16.mxu0 %v1244_v0 }
  0xa5   : > { %v348_v11 = vsub.f32 %v328_v54, %v340_v3 }
  0xa6   : > { %585 = vmatpush1.bf16.msra.mxu0 %v1499_v4  ;;  %909 = vmatpush1.bf16.msra.mxu1 %v1499_v4  ;;  %v341_v4 = vunpack.c.h.bf16 %v334_v57 }
  0xa7   : > { %586 = vmatprep.subr.bf16.mxu0 %v1503_v5  ;;  %902 = vmatprep.subr.bf16.mxu1 %v1503_v5  ;;  %v891_v5 = vpack.c.bf16 %v323_v59, %v322_v58 }
  0xa8   : > { %v349_v12 = vsub.f32 %v329_v55, %v341_v4 }
  0xa9   : > { %886 = vmatmul.mubr.msk.bf16.gmra.mrb[4].mxu1 %vm884_vm10, %v885_v39  ;;  %552 = vmatmul.mubr.bf16.gmra.mrb[4].mxu0 %v289_v25 }
  0xaa   : > { %587 = vmatpush1.bf16.msra.mxu0 %v1507_v6  ;;  %910 = vmatpush1.bf16.msra.mxu1 %v1507_v6  ;;  %v330_v6 = vsel %vm1642_vm3, %v322_v58, 0.0  ;;  %v354_v17 = vpack.c.bf16 %v349_v12, %v348_v11 }
  0xab   : > { %588 = vmatprep.subr.bf16.mxu0 %v1511_v7  ;;  %903 = vmatprep.subr.bf16.mxu1 %v1511_v7  ;;  %v331_v7 = vsel %vm1649_vm4, %v323_v59, 0.0 }
  0xac   : > { %488 = vmatprep.mubr.bf16.mxu1 %v1244_v0  ;;  %561 = vmatprep.mubr.bf16.mxu0 %v1244_v0 }
  0xae   : > { %589 = vmatpush1.bf16.msra.mxu0 %v1515_v8  ;;  %911 = vmatpush1.bf16.msra.mxu1 %v1515_v8  ;;  %v344_v8 = vsub.f32 %v324_v50, %v336_v62 }
  0xaf   : > { %590 = vmatprep.subr.bf16.mxu0 %v1519_v9  ;;  %904 = vmatprep.subr.bf16.mxu1 %v1519_v9  ;;  %v345_v9 = vsub.f32 %v325_v51, %v337_v63 }
  0xb1   : > { %889 = vmatmul.mubr.msk.bf16.gmra.mrb[8].mxu1 %vm887_vm15, %v888_v52  ;;  %562 = vmatmul.mubr.bf16.gmra.mrb[8].mxu0 %v290_v36 }
  0xb2   : > { %591 = vmatpush1.bf16.msra.mxu0 %v1523_v10  ;;  %912 = vmatpush1.bf16.msra.mxu1 %v1523_v10  ;;  %v333_v10 = vpack.c.bf16 %v327_v2, %v326_v1 }
  0xb3   : > { %592 = vmatprep.subr.bf16.mxu0 %v1529_v13  ;;  %905 = vmatprep.subr.bf16.mxu1 %v1529_v13  ;;  %v335_v13 = vpack.c.bf16 %v331_v7, %v330_v6 }
  0xb4   : > { %498 = vmatprep.mubr.bf16.mxu1 %v1244_v0  ;;  %571 = vmatprep.mubr.bf16.mxu0 %v1244_v0  ;;  %v338_v14 = vunpack.c.l.bf16 %v333_v10 }
  0xb5   : > { %v342_v18 = vunpack.c.l.bf16 %v335_v13  ;;  %v343_v20 = vunpack.c.h.bf16 %v335_v13 }
  0xb6   : > { %593 = vmatpush1.bf16.msra.mxu0 %v1533_v15  ;;  %913 = vmatpush1.bf16.msra.mxu1 %v1533_v15  ;;  %v339_v15 = vunpack.c.h.bf16 %v333_v10  ;;  %v346_v21 = vsub.f32 %v326_v1, %v338_v14 }
  0xb7   : > { %594 = vmatprep.subr.bf16.mxu0 %v1537_v16  ;;  %906 = vmatprep.subr.bf16.mxu1 %v1537_v16  ;;  %v352_v16 = vpack.c.bf16 %v345_v9, %v344_v8  ;;  %v350_v23 = vsub.f32 %v330_v6, %v342_v18 }
  0xb9   : > { %892 = vmatmul.mubr.msk.bf16.gmra.mrb[12].mxu1 %vm890_vm2, %v891_v5  ;;  %572 = vmatmul.mubr.bf16.gmra.mrb[12].mxu0 %v291_v44  ;;  %v673_v44 = vlaneseq }
  0xba   : > { %595 = vmatpush1.bf16.msra.mxu0 %v1541_v19  ;;  %914 = vmatpush1.bf16.msra.mxu1 %v1541_v19  ;;  %v347_v19 = vsub.f32 %v327_v2, %v339_v15 }
  0xbb   : > { %596 = vmatprep.subr.bf16.mxu0 %v1547_v22  ;;  %907 = vmatprep.subr.bf16.mxu1 %v1547_v22  ;;  %v351_v22 = vsub.f32 %v331_v7, %v343_v20  ;;  %v674_v46 = vshrl.u32 %v673_v44, 7 }
  0xbc   : > { %614 = vmatprep.mubr.bf16.mxu0 %v1244_v0  ;;  %634 = vmatprep.mubr.bf16.mxu1 %v1244_v0  ;;  %v353_v24 = vpack.c.bf16 %v347_v19, %v346_v21 }
  0xbd   : > { %v355_v25 = vpack.c.bf16 %v351_v22, %v350_v23  ;;  %v675_v58 = vsub.s32 0, %v674_v46  ;;  %v679_v61 = vsub.s32 1, %v674_v46 }
  0xbe   : > { %597 = vmatpush1.bf16.msra.mxu0 %v1551_v26  ;;  %915 = vmatpush1.bf16.msra.mxu1 %v1551_v26 }
  0xbf   : > { %v676_v62 = vrot.slane %v671_v60, %v675_v58  ;;  %v1693_v2 = vrot.slane %v671_v60, %v679_v61 }
  0xc1   : > { %615 = vmatmul.mubr.bf16.vlgmr.msra.gmra.mrb[0].mxu0 %v352_v16  ;;  %635 = vmatmul.mubr.bf16.vlgmr.msra.gmra.mrb[16].mxu1 %v354_v17 }
  0xc2   : > { %624 = vmatprep.mubr.bf16.mxu0 %v1244_v0  ;;  %644 = vmatprep.mubr.bf16.mxu1 %v1244_v0 }
  0xc9   : > { %625 = vmatmul.mubr.bf16.gmra.mrb[4].mxu0 %v353_v24  ;;  %645 = vmatmul.mubr.bf16.gmra.mrb[20].mxu1 %v355_v25 }
 0x174   : > { %v470_v27 = vpop.f32.mrb[0].mxu1 }
 0x175   : > { %v472_v28 = vpop.f32.mrb[1].mxu1 }
 0x176   : > { %v474_v29 = vpop.f32.mrb[2].mxu1 }
 0x177   : > { %v476_v30 = vpop.f32.mrb[3].mxu1 }
 0x17c   : > { %v1683_v31 = vpop.f32.mrb[4].mxu1 }
 0x17d   : > { %v1685_v26 = vpop.f32.mrb[5].mxu1 }
 0x17e   : > { %v1687_v32 = vpop.f32.mrb[6].mxu1 }
 0x17f   : > { %v1689_v33 = vpop.f32.mrb[7].mxu1 }
 0x184   : > { %v490_v34 = vpop.f32.mrb[8].mxu1  ;;  %v563_v35 = vpop.f32.mrb[8].mxu0 }
 0x185   : > { %v564_v36 = vadd.f32 %v563_v35, %v490_v34  ;;  %v492_v0 = vpop.f32.mrb[9].mxu1  ;;  %v565_v37 = vpop.f32.mrb[9].mxu0 }
 0x186   : > { %v566_v38 = vadd.f32 %v565_v37, %v492_v0  ;;  %v494_v39 = vpop.f32.mrb[10].mxu1  ;;  %v567_v40 = vpop.f32.mrb[10].mxu0 }
 0x187   : > { %v568_v41 = vadd.f32 %v567_v40, %v494_v39  ;;  %v496_v42 = vpop.f32.mrb[11].mxu1  ;;  %v569_v43 = vpop.f32.mrb[11].mxu0 }
 0x188   : > { %v570_v45 = vadd.f32 %v569_v43, %v496_v42 }
 0x18c   : > { %v500_v47 = vpop.f32.mrb[12].mxu1  ;;  %v573_v48 = vpop.f32.mrb[12].mxu0 }
 0x18d   : > { %v574_v49 = vadd.f32 %v573_v48, %v500_v47  ;;  %v502_v50 = vpop.f32.mrb[13].mxu1  ;;  %v575_v51 = vpop.f32.mrb[13].mxu0 }
 0x18e   : > { %v576_v52 = vadd.f32 %v575_v51, %v502_v50  ;;  %v504_v53 = vpop.f32.mrb[14].mxu1  ;;  %v577_v54 = vpop.f32.mrb[14].mxu0 }
 0x18f   : > { %v578_v55 = vadd.f32 %v577_v54, %v504_v53  ;;  %v506_v56 = vpop.f32.mrb[15].mxu1  ;;  %v579_v57 = vpop.f32.mrb[15].mxu0 }
 0x190   : > { %v580_v59 = vadd.f32 %v579_v57, %v506_v56 }
 0x194   : > { %v616_v63 = vpop.f32.mrb[0].mxu0  ;;  %v636_v1 = vpop.f32.mrb[16].mxu1 }
 0x195   : > { %v916_v3 = vadd.f32 %v616_v63, %v470_v27  ;;  %v663_v4 = vadd.f32 %v636_v1, %v564_v36  ;;  %v618_v5 = vpop.f32.mrb[1].mxu0  ;;  %v638_v6 = vpop.f32.mrb[17].mxu1 }
 0x196   : > { %v917_v7 = vadd.f32 %v618_v5, %v472_v28  ;;  %v664_v8 = vadd.f32 %v638_v6, %v566_v38  ;;  %v620_v9 = vpop.f32.mrb[2].mxu0  ;;  %v640_v10 = vpop.f32.mrb[18].mxu1 }
 0x197   : > { %v683_v11 = vadd.f32 %v916_v3, %v676_v62  ;;  %v691_v12 = vadd.f32 %v676_v62, %v663_v4  ;;  %v918_v13 = vadd.f32 %v620_v9, %v474_v29  ;;  %v665_v14 = vadd.f32 %v640_v10, %v568_v41  ;;  %v622_v15 = vpop.f32.mrb[3].mxu0  ;;  %v642_v16 = vpop.f32.mrb[19].mxu1 }
 0x198   : > { %v684_v17 = vadd.f32 %v917_v7, %v1693_v2  ;;  %v692_v18 = vadd.f32 %v1693_v2, %v664_v8  ;;  %v919_v20 = vadd.f32 %v622_v15, %v476_v30  ;;  %v666_v21 = vadd.f32 %v642_v16, %v570_v45 }
 0x199   : > { %699 = vst [vmem:[%s1697_s22] sm:$0xff] %v683_v11  ;;  %707 = vst [vmem:[%s1697_s22 + $0x40] sm:$0xff] %v691_v12  ;;  %v685_v19 = vadd.f32 %v918_v13, %v676_v62  ;;  %v693_v23 = vadd.f32 %v676_v62, %v665_v14 }
 0x19a   : > { %700 = vst [vmem:[%s1697_s22 + $0x8] sm:$0xff] %v684_v17  ;;  %708 = vst [vmem:[%s1697_s22 + $0x48] sm:$0xff] %v692_v18  ;;  %v686_v22 = vadd.f32 %v919_v20, %v1693_v2  ;;  %v694_v24 = vadd.f32 %v1693_v2, %v666_v21 }
 0x19b   : > { %701 = vst [vmem:[%s1697_s22 + $0x10] sm:$0xff] %v685_v19  ;;  %709 = vst [vmem:[%s1697_s22 + $0x50] sm:$0xff] %v693_v23 }
 0x19c   : > { %702 = vst [vmem:[%s1697_s22 + $0x18] sm:$0xff] %v686_v22  ;;  %710 = vst [vmem:[%s1697_s22 + $0x58] sm:$0xff] %v694_v24  ;;  %v626_v25 = vpop.f32.mrb[4].mxu0  ;;  %v646_v27 = vpop.f32.mrb[20].mxu1 }
 0x19d   : > { %v920_v28 = vadd.f32 %v626_v25, %v1683_v31  ;;  %v667_v29 = vadd.f32 %v646_v27, %v574_v49  ;;  %v628_v30 = vpop.f32.mrb[5].mxu0  ;;  %v648_v34 = vpop.f32.mrb[21].mxu1 }
 0x19e   : > { %v921_v35 = vadd.f32 %v628_v30, %v1685_v26  ;;  %v668_v36 = vadd.f32 %v648_v34, %v576_v52  ;;  %v630_v0 = vpop.f32.mrb[6].mxu0  ;;  %v650_v37 = vpop.f32.mrb[22].mxu1 }
 0x19f   : > { %v687_v38 = vadd.f32 %v920_v28, %v676_v62  ;;  %v695_v39 = vadd.f32 %v676_v62, %v667_v29  ;;  %v922_v40 = vadd.f32 %v630_v0, %v1687_v32  ;;  %v669_v41 = vadd.f32 %v650_v37, %v578_v55  ;;  %v632_v31 = vpop.f32.mrb[7].mxu0  ;;  %v652_v42 = vpop.f32.mrb[23].mxu1 }
 0x1a0   : > { %v688_v43 = vadd.f32 %v921_v35, %v1693_v2  ;;  %v696_v26 = vadd.f32 %v1693_v2, %v668_v36  ;;  %v923_v44 = vadd.f32 %v632_v31, %v1689_v33  ;;  %v670_v45 = vadd.f32 %v652_v42, %v580_v59 }
 0x1a1   : > { %703 = vst [vmem:[%s1697_s22 + $0x20] sm:$0xff] %v687_v38  ;;  %711 = vst [vmem:[%s1697_s22 + $0x60] sm:$0xff] %v695_v39  ;;  %v689_v32 = vadd.f32 %v922_v40, %v676_v62  ;;  %v697_v46 = vadd.f32 %v676_v62, %v669_v41 }
 0x1a2   : > { %704 = vst [vmem:[%s1697_s22 + $0x28] sm:$0xff] %v688_v43  ;;  %712 = vst [vmem:[%s1697_s22 + $0x68] sm:$0xff] %v696_v26  ;;  %v690_v33 = vadd.f32 %v923_v44, %v1693_v2  ;;  %v698_v47 = vadd.f32 %v1693_v2, %v670_v45 }
 0x1a3   : > { %705 = vst [vmem:[%s1697_s22 + $0x30] sm:$0xff] %v689_v32  ;;  %713 = vst [vmem:[%s1697_s22 + $0x70] sm:$0xff] %v697_v46 }
 0x1a4   : > { %706 = vst [vmem:[%s1697_s22 + $0x38] sm:$0xff] %v690_v33  ;;  %714 = vst [vmem:[%s1697_s22 + $0x78] sm:$0xff] %v698_v47 }
 0x1a5   : > { %1159 = shalt.err (!%p1156_p10)
}
 0x1a6   : > { %s1160_s10 = scalar_lea.hbm %s1720_s7, 2048  ;;  %s1164_s20 = scalar_lea.hbm %s1783_s3, 6144 }
 0x1a7   : > { %p1161_p5 = scmp.ne.s32.totalorder %s1720_s7, %s1160_s10  ;;  %p1165_p12 = scmp.lt.u32.totalorder %s1720_s7, %s1783_s3 }
 0x1a8   : > { %p1166_p9 = scmp.lt.u32.totalorder %s1164_s20, %s1160_s10  ;;  %p1168_p3 = scmp.lt.u32.totalorder %s1160_s10, %s1720_s7 }
 0x1a9   : > { %p1162_p13 = pnand %p1161_p5, %p1828_p7 }
 0x1aa   : > { %p1167_p0 = por %p1166_p9, %p1165_p12 }
 0x1ab   : > { %p1163_p11 = pneg %p1162_p13 }
 0x1ac   : > { %p1169_p8 = por %p1168_p3, %p1167_p0 }
 0x1ae   : > { %p1170_p1 = pnand %p1169_p8, %p1163_p11 }
 0x1b0   : > { %1173 = shalt.err (!%p1170_p1)
}
 0x1b1   : > { %s1247_s25 = smov 256   ;;  %s1248_s29 = smov 768  }
 0x1b2   : > { %s1249_s30 = smov 16  }
 0x1b3   : > { %956 = dma.vmem_to_hbm [thread:$0]  (%p1828_p7), %s1724_s28, 2048, %s1720_s7, %s716_s19, %s1247_s25, %s1248_s29, %s1249_s30  }
 0x1b4 PF: > { %p976_p4 = scmp.ge.s32.totalorder %s1236_s17, 2  ;;  %s747_s18 = sand.u32 1, %s1216_s12  }
 0x1b5   : > { %p1829_p6 = scmp.ne.s32.totalorder %s1796_s24, 0  ;;  %s748_s22 = scalar_lea.sflag [#allocation4], %s747_s18 }
 0x1b7   : > { %p970_p2 = pnand %p976_p4, %p1829_p6 }
 0x1b9   : > { %1211 = dma.done.wait (!%p970_p2), %s748_s22, 2048  }
 0x1ba   : > { %1213 = vsyncadd (!%p970_p2), %s748_s22, 4294965248  ;;  %s22_s17 = sadd.s32 1, %s1236_s17   ;;  %s1830_s9 = sld [smem:[#allocation14_spill]] }
 0x1bb   : > { %p19_p10 = scmp.ge.s32.totalorder %s22_s17, 5   ;;  %s1831_s23 = sld [smem:[#allocation13_spill]] }
 0x1bc   : > { %s1832_s12 = smov %s1220_s13  ;;  %s1833_s13 = smov %s1224_s14 }
 0x1bd   : > { %s1835_s15 = smov %s1232_s16  ;;  %21 = sbr.rel (!%p19_p10) target bundleno = 11 (0xb), region = 94 }
 0x1c0   : > { %s1834_s14 = smov %s1830_s9 }
 0x1c1   : > { %s1836_s16 = smov %s1831_s23 }
 0x1c4   :  { %753 = vsyncpa [#allocation3], 1 }
 0x1c5   :  { %755 = vsyncpa [#allocation3 + $0x1], 1 }
 0x1c6   :  { %756 = vsyncpa [#allocation6], 1 }
 0x1c7   :  { %758 = vsyncpa [#allocation6 + $0x1], 1 }
 0x1c8   :  { %759 = vsyncpa [#allocation4], 1 }
 0x1c9   :  { %761 = vsyncpa [#allocation4 + $0x1], 1 }

</bundles_post_ra>
